<compile_context>
chip_gen: v7x
topology: tpu7x:2x2x1
jax: 0.10.0
libtpu: 0.0.40
codegen_flags: <defaults>
</compile_context>

<pallas_src>
import functools
import math

import numpy as np
import jax
import jax.numpy as jnp
from jax.experimental import pallas as pl
from jax.experimental.pallas import tpu as pltpu

LANES = 384                              # 3 coords * 128 lanes -> lane-dense blocks
assert LANES % 3 == 0                    # roll-wraparound safety relies on this
TARGET_BLOCK_BYTES = 6 * 1024 * 1024     # ~6 MiB per block, ~24 MiB double-buffered


def _rot_z_kernel(a_ref, b_ref, c_ref, x_ref, o_ref):
    """Rotate interleaved [x0,y0,z0,x1,...] lanes about the z axis.

    a/b/c: (1, LANES) f32 per-lane weights (resident in VMEM).
    x_ref/o_ref: (row_tile, LANES) blocks in the original dtype.
    out[i] = a[i]*v[i] + b[i-1]*v[i-1] + c[i+1]*v[i+1]
    Wrapped neighbours (lane 0 <- lane 383 and lane 383 <- lane 0) always hit
    zero weights because LANES is a multiple of 3 and lane 0 is an x lane.
    """
    v = x_ref[...].astype(jnp.float32)
    out = a_ref[...] * v                                        # self term (VPU)
    out = out + pltpu.roll(b_ref[...] * v, 1, axis=1)           # lane i += b[i-1]*v[i-1]
    out = out + pltpu.roll(c_ref[...] * v, LANES - 1, axis=1)   # lane i += c[i+1]*v[i+1]
    o_ref[...] = out.astype(o_ref.dtype)


def _pick_row_tile(rows, itemsize):
    """~6 MiB blocks; >=2 grid steps for mid-size inputs (v7x has 2 TCs)."""
    base = max(8, TARGET_BLOCK_BYTES // (LANES * itemsize))   # 4096 f32, 8192 bf16
    if rows >= 2 * base:
        return base
    if rows >= 16:
        half = (rows + 1) // 2
        return ((half + 7) // 8) * 8                          # multiple of 8, >=2 steps
    return rows                                               # full-extent block


def _rotate_aligned(x2, weights, row_tile):
    """Run the kernel over a (rows, LANES) lane-dense view."""
    rows = x2.shape[0]
    a, b, c = weights
    grid = (pl.cdiv(rows, row_tile),)
    return pl.pallas_call(
        _rot_z_kernel,
        out_shape=jax.ShapeDtypeStruct(x2.shape, x2.dtype),
        grid=grid,
        in_specs=[
            pl.BlockSpec((1, LANES), lambda i: (0, 0)),        # a (resident)
            pl.BlockSpec((1, LANES), lambda i: (0, 0)),        # b (resident)
            pl.BlockSpec((1, LANES), lambda i: (0, 0)),        # c (resident)
            pl.BlockSpec((row_tile, LANES), lambda i: (i, 0)),
        ],
        out_specs=pl.BlockSpec((row_tile, LANES), lambda i: (i, 0)),
        compiler_params=pltpu.CompilerParams(
            dimension_semantics=("parallel",),                 # shards rows over v7x TCs
            vmem_limit_bytes=32 * 1024 * 1024,                 # ~24 MiB used, headroom
        ),
    )(a, b, c, x2)


@functools.partial(jax.jit, static_argnums=1)
def rotation_layer(x, theta):
    """Equivalent of RotationLayer.forward: x @ R_z(theta), x shape (..., 3).

    `theta` is a Python float (compile-time constant, as in the nn.Module
    where R is fixed at __init__).
    """
    assert x.shape[-1] == 3, "last dim must be 3 (xyz coordinates)"
    orig_shape = x.shape
    dtype = x.dtype

    cos_t, sin_t = math.cos(theta), math.sin(theta)
    reps = LANES // 3
    a = jnp.asarray(np.tile(np.array([cos_t, cos_t, 1.0], np.float32), reps)[None, :])
    b = jnp.asarray(np.tile(np.array([-sin_t, 0.0, 0.0], np.float32), reps)[None, :])
    c = jnp.asarray(np.tile(np.array([0.0, sin_t, 0.0], np.float32), reps)[None, :])
    weights = (a, b, c)

    flat = x.reshape(-1)                         # free row-major flatten
    n = flat.shape[0]
    n_main = (n // LANES) * LANES                # 384-aligned prefix
    itemsize = jnp.dtype(dtype).itemsize

    if n_main == 0:
        # Fewer than 128 points: pad the (tiny) flat array to one lane-dense row.
        padded = jnp.pad(flat, (0, LANES - n)).reshape(1, LANES)
        out = _rotate_aligned(padded, weights, row_tile=1)
        return out.reshape(-1)[:n].reshape(orig_shape)

    rows = n_main // LANES
    row_tile = _pick_row_tile(rows, itemsize)
    main_out = _rotate_aligned(flat[:n_main].reshape(rows, LANES), weights, row_tile)
    main_flat = main_out.reshape(-1)

    if n_main == n:
        return main_flat.reshape(orig_shape)

    # <128-point tail: rotate with plain jnp (avoids a full-array pad + slice pass).
    R = jnp.array([[cos_t, -sin_t, 0.0],
                   [sin_t,  cos_t, 0.0],
                   [0.0,    0.0,   1.0]], dtype=jnp.float32)
    tail = flat[n_main:].reshape(-1, 3).astype(jnp.float32)
    tail_out = jnp.matmul(tail, R).astype(dtype).reshape(-1)
    return jnp.concatenate([main_flat, tail_out]).reshape(orig_shape)


if __name__ == "__main__":
    theta = 0.3   # asymmetric angle (cos != sin) so a cos/sin swap would be caught
    c_t, s_t = math.cos(theta), math.sin(theta)
    R_ref = jnp.array([[c_t, -s_t, 0.0],
                       [s_t,  c_t, 0.0],
                       [0.0,  0.0, 1.0]], dtype=jnp.float32)

    key = jax.random.PRNGKey(0)
    k1, k2, k3 = jax.random.split(key, 3)

    tests = [
        ("aligned_128pts", jax.random.normal(k1, (2, 8, 8, 3), dtype=jnp.float32)),
        ("tiny_64pts",     jax.random.normal(k2, (2, 8, 4, 3), dtype=jnp.float32)),
        ("prefix_tail",    jax.random.normal(k3, (2, 100, 7, 3), dtype=jnp.float32)),
    ]
    for name, x in tests:
        y = rotation_layer(x, theta)
        jax.block_until_ready(y)
        y_ref = jnp.matmul(x, R_ref)
        assert y.shape == x.shape, f"shape mismatch in {name}"
        assert jnp.allclose(y, y_ref, atol=1e-5, rtol=1e-5), f"mismatch vs reference in {name}"

    print("KERNEL_OK")
</pallas_src>

<mosaic_0001>
module attributes {stable_mosaic.version = 11 : i64} {
  func.func @_rot_z_kernel(%arg0: i32, %arg1: memref<1x384xf32, #tpu.memory_space<vmem>>, %arg2: memref<1x384xf32, #tpu.memory_space<vmem>>, %arg3: memref<1x384xf32, #tpu.memory_space<vmem>>, %arg4: memref<1x384xf32, #tpu.memory_space<vmem>>, %arg5: memref<1x384xf32, #tpu.memory_space<vmem>>) attributes {dimension_semantics = [#tpu.dimension_semantics<parallel>], iteration_bounds = array<i64: 1>, scalar_prefetch = 0 : i64, scratch_operands = 0 : i64, tpu.core_type = #tpu.core_type<tc>, window_params = [{pipeline_mode = #tpu.pipeline_mode<synchronous>, transform_indices = @transform_0, window_bounds = array<i64: 1, 384>}, {pipeline_mode = #tpu.pipeline_mode<synchronous>, transform_indices = @transform_1, window_bounds = array<i64: 1, 384>}, {pipeline_mode = #tpu.pipeline_mode<synchronous>, transform_indices = @transform_2, window_bounds = array<i64: 1, 384>}, {transform_indices = @transform_3, window_bounds = array<i64: 1, 384>}, {transform_indices = @transform_4, window_bounds = array<i64: 1, 384>}]} {
    %c0 = arith.constant 0 : index
    %c0_0 = arith.constant 0 : index
    %0 = vector.load %arg4[%c0, %c0_0] : memref<1x384xf32, #tpu.memory_space<vmem>>, vector<1x384xf32>
    %c0_1 = arith.constant 0 : index
    %c0_2 = arith.constant 0 : index
    %1 = vector.load %arg1[%c0_1, %c0_2] : memref<1x384xf32, #tpu.memory_space<vmem>>, vector<1x384xf32>
    %2 = arith.mulf %1, %0 : vector<1x384xf32>
    %c0_3 = arith.constant 0 : index
    %c0_4 = arith.constant 0 : index
    %3 = vector.load %arg2[%c0_3, %c0_4] : memref<1x384xf32, #tpu.memory_space<vmem>>, vector<1x384xf32>
    %4 = arith.mulf %3, %0 : vector<1x384xf32>
    %c1_i32 = arith.constant 1 : i32
    %5 = tpu.dynamic_rotate %4 by %c1_i32 dim 1 : vector<1x384xf32>, i32 -> vector<1x384xf32>
    %6 = arith.addf %2, %5 : vector<1x384xf32>
    %c0_5 = arith.constant 0 : index
    %c0_6 = arith.constant 0 : index
    %7 = vector.load %arg3[%c0_5, %c0_6] : memref<1x384xf32, #tpu.memory_space<vmem>>, vector<1x384xf32>
    %8 = arith.mulf %7, %0 : vector<1x384xf32>
    %c383_i32 = arith.constant 383 : i32
    %9 = tpu.dynamic_rotate %8 by %c383_i32 dim 1 : vector<1x384xf32>, i32 -> vector<1x384xf32>
    %10 = arith.addf %6, %9 : vector<1x384xf32>
    %c0_7 = arith.constant 0 : index
    %c0_8 = arith.constant 0 : index
    %11 = vector.load %arg5[%c0_7, %c0_8] : memref<1x384xf32, #tpu.memory_space<vmem>>, vector<1x384xf32>
    tpu.vector_store %arg5[%c0_7, %c0_8], %10 {strides = array<i32>} : memref<1x384xf32, #tpu.memory_space<vmem>>, vector<1x384xf32>,
    return
  }
  func.func @transform_0(%arg0: i32) -> (i32, i32) {
    %c0_i32 = arith.constant 0 : i32
    %c0_i32_0 = arith.constant 0 : i32
    %c0_i32_1 = arith.constant 0 : i32
    return %c0_i32, %c0_i32_0 : i32, i32
  }
  func.func @transform_1(%arg0: i32) -> (i32, i32) {
    %c0_i32 = arith.constant 0 : i32
    %c0_i32_0 = arith.constant 0 : i32
    %c0_i32_1 = arith.constant 0 : i32
    return %c0_i32, %c0_i32_0 : i32, i32
  }
  func.func @transform_2(%arg0: i32) -> (i32, i32) {
    %c0_i32 = arith.constant 0 : i32
    %c0_i32_0 = arith.constant 0 : i32
    %c0_i32_1 = arith.constant 0 : i32
    return %c0_i32, %c0_i32_0 : i32, i32
  }
  func.func @transform_3(%arg0: i32) -> (i32, i32) {
    %c0_i32 = arith.constant 0 : i32
    %c0_i32_0 = arith.constant 0 : i32
    return %arg0, %c0_i32 : i32, i32
  }
  func.func @transform_4(%arg0: i32) -> (i32, i32) {
    %c0_i32 = arith.constant 0 : i32
    %c0_i32_0 = arith.constant 0 : i32
    return %arg0, %c0_i32 : i32, i32
  }
}

</mosaic_0001>

<bundles_post_ra>
// kernel: rotation_layer.1
= control target key start
LH: loop header
LB: loop body
LE: loop exit
PB: predicated region body
PF: predicated region fallthrough
CT: control target
= control target key end

     0   :  { %v23_v0 = vlaneseq  ;;  %s146_s21 = smov 1   ;;  %v148_v16 = vmov 1966171168   ;;  %s189_s1 = inlined_call_operand.vmem [shape: f32[1,384], index: 1, kind: input, shape index: {}]   ;;  %s190_s3 = inlined_call_operand.vmem [shape: f32[1,384], index: 3, kind: input, shape index: {}]   ;;  %s191_s2 = inlined_call_operand.vmem [shape: f32[1,384], index: 2, kind: input, shape index: {}]   ;;  %s192_s0 = inlined_call_operand.vmem [shape: f32[1,384], index: 0, kind: input, shape index: {}]   ;;  %s193_s4 = inlined_call_operand.vmem [shape: f32[1,384], index: 4, kind: output, shape index: {}]  }
   0x1   :  { %v17_v1 = vld [vmem:[%s190_s3] sm:$0x7]  ;;  %s147_s3 = smov 127   ;;  %v55_v17 = vunpack.c.l.s4 %v148_v16 }
   0x2   :  { %v20_v2 = vld [vmem:[%s189_s1] sm:$0x7]  ;;  %v24_v4 = vshrl.u32 %v23_v0, 7  ;;  %v45_v19 = vand.u32 127, %v23_v0  ;;  %vm136_vm2 = vcmp.lt.s32.totalorder %v23_v0, 384 }
   0x3   :  { %v21_v3 = vmul.f32 %v20_v2, %v17_v1  ;;  %v78_v5 = vld [vmem:[%s191_s2] sm:$0x7]  ;;  %v56_v18 = vunpack.c.0.s8 %v55_v17 }
   0x4   :  { %v33_v6 = vsub.s32 2, %v24_v4  ;;  %v25_v7 = vsub.s32 0, %v24_v4  ;;  %v79_v8 = vmul.f32 %v78_v5, %v17_v1  ;;  %v29_v9 = vsub.s32 1, %v24_v4  ;;  %v18_v30 = vld [vmem:[%s192_s0] sm:$0x7] }
   0x5   :  { %v59_v22 = vsub.s32 %v56_v18, %v24_v4  ;;  %vm46_vm0 = vcmp.lt.s32.totalorder %v45_v19, 1  ;;  %vm102_vm1 = vcmp.lt.s32.totalorder %v45_v19, 127  ;;  %v19_v37 = vmul.f32 %v18_v30, %v17_v1 }
   0x6   :  { %v34_v10 = vrot.slane %v21_v3, %v33_v6  ;;  %v26_v11 = vrot.slane %v21_v3, %v25_v7  ;;  %v84_v12 = vrot.slane %v79_v8, %v25_v7  ;;  %v30_v13 = vrot.slane %v21_v3, %v29_v9 }
   0x7   :  { %v92_v14 = vrot.slane %v79_v8, %v33_v6  ;;  %v88_v15 = vrot.slane %v79_v8, %v29_v9 }
   0x8   :  { %42 = vrot.lane.b32.xlu1 %v34_v10, %s146_s21  ;;  %38 = vrot.lane.b32.xlu0 %v26_v11, %s146_s21 }
   0xc   :  { %96 = vrot.lane.b32.xlu1 %v84_v12, %s147_s3  ;;  %40 = vrot.lane.b32.xlu0 %v30_v13, %s146_s21 }
  0x10   :  { %100 = vrot.lane.b32.xlu1 %v92_v14, %s147_s3  ;;  %98 = vrot.lane.b32.xlu0 %v88_v15, %s147_s3 }
  0x7a   :  { %v43_v20 = vpop.permute.xlu1 %42  ;;  %v39_v21 = vpop.permute.xlu0 %38 }
  0x7b   :  { %v49_v25 = vsel %vm46_vm0, %v43_v20, %v39_v21 }
  0x7e   :  { %v97_v23 = vpop.permute.xlu1 %96  ;;  %v41_v24 = vpop.permute.xlu0 %40 }
  0x7f   :  { %v47_v26 = vsel %vm46_vm0, %v41_v24, %v43_v20  ;;  %v48_v27 = vsel %vm46_vm0, %v39_v21, %v41_v24 }
  0x80   :  { %v53_v28 = vcombine.low %v49_v25, %v48_v27  ;;  %v67_v29 = vrot.slane %v47_v26, %v59_v22 }
  0x82   :  { %v60_v31 = vrot.slane %v53_v28, %v59_v22  ;;  %v101_v32 = vpop.permute.xlu1 %100  ;;  %v99_v33 = vpop.permute.xlu0 %98 }
  0x83   :  { %v105_v34 = vsel %vm102_vm1, %v101_v32, %v97_v23  ;;  %v103_v35 = vsel %vm102_vm1, %v99_v33, %v101_v32  ;;  %v104_v36 = vsel %vm102_vm1, %v97_v23, %v99_v33 }
  0x84   :  { %v68_v38 = vcombine.low %v60_v31, %v67_v29  ;;  %v123_v39 = vrot.slane %v105_v34, %v59_v22  ;;  %v109_v40 = vcombine.low %v104_v36, %v103_v35 }
  0x86   :  { %v75_v41 = vrot.slane %v68_v38, %v59_v22  ;;  %v116_v42 = vrot.slane %v109_v40, %v59_v22 }
  0x88   :  { %v77_v43 = vadd.f32 %v75_v41, %v19_v37  ;;  %v124_v44 = vcombine.low %v116_v42, %v123_v39 }
  0x8a   :  { %v131_v45 = vrot.slane %v124_v44, %v59_v22 }
  0x8c   :  { %v133_v46 = vadd.f32 %v131_v45, %v77_v43 }
  0x8e   :  { %138 = vst.msk [vmem:[%s193_s4] sm:$0x7] %vm136_vm2, %v133_v46 }

</bundles_post_ra>
